<compile_context>
chip_gen: v7x
topology: tpu7x:2x2x1
jax: 0.10.0
libtpu: 0.0.40
codegen_flags: <defaults>
</compile_context>

<pallas_src>
import jax
import jax.numpy as jnp
from jax.experimental import pallas as pl
from jax.experimental.pallas import tpu as pltpu

INPUT_SIZE = 16
HIDDEN_SIZE = 64      # nn.Linear default hidden_layer_size in the module
OUTPUT_SIZE = 8


# --------------------------------------------------------------------------
# Kernel: one batch tile, transposed (lane-dense) layout.
#   out[:, b] = softmax(Wc[idx[b], :] + bc)   (softmax over the OUT axis,
#   which is PyTorch's dim=0 of the 1-D output)
# --------------------------------------------------------------------------
def policy_kernel(idx_ref, wct_ref, out_ref):
    idx = idx_ref[...]                                             # [1, TB] int32
    tb = idx.shape[1]

    # Augmented "one-hot^T": column b is the basis vector for idx[b] plus a
    # constant 1 in row INPUT_SIZE (the bias row).  Out-of-range idx yields a
    # bias-only column (the original numpy one-hot would have errored).
    rows = jax.lax.broadcasted_iota(jnp.int32, (INPUT_SIZE + 1, tb), 0)
    onehot_t = jnp.where((rows == idx) | (rows == INPUT_SIZE),
                         jnp.float32(1.0), jnp.float32(0.0))       # [IN+1, TB]

    # Gather-by-matmul on the bias-augmented fused table:
    #   [OUT, IN+1] @ [IN+1, TB] = Wc[idx, :]^T + bc^T
    logits = jnp.dot(wct_ref[...], onehot_t,
                     preferred_element_type=jnp.float32)           # [OUT, TB]

    # Softmax over the OUTPUT axis (axis 0 here).  Exact divide: the kernel is
    # overhead-bound, not EUP-bound, and exactness keeps sum(probs)==1.
    m = jnp.max(logits, axis=0, keepdims=True)                     # [1, TB]
    e = jnp.exp(logits - m)
    denom = jnp.sum(e, axis=0, keepdims=True)                      # [1, TB]
    out_ref[...] = e / denom


# --------------------------------------------------------------------------
# Host-side helpers
# --------------------------------------------------------------------------
def init_params(key):
    """Mimics nn.Linear default init (U[-1/sqrt(fan_in), +1/sqrt(fan_in)]).

    Weights stored as [in_features, out_features] (transpose of PyTorch's
    [out, in] convention); biases as [1, out_features].
    """
    k1, k2, k3, k4 = jax.random.split(key, 4)
    bound1 = 1.0 / jnp.sqrt(jnp.float32(INPUT_SIZE))
    bound2 = 1.0 / jnp.sqrt(jnp.float32(HIDDEN_SIZE))
    w1 = jax.random.uniform(k1, (INPUT_SIZE, HIDDEN_SIZE), jnp.float32,
                            -bound1, bound1)
    b1 = jax.random.uniform(k2, (1, HIDDEN_SIZE), jnp.float32, -bound1, bound1)
    w2 = jax.random.uniform(k3, (HIDDEN_SIZE, OUTPUT_SIZE), jnp.float32,
                            -bound2, bound2)
    b2 = jax.random.uniform(k4, (1, OUTPUT_SIZE), jnp.float32, -bound2, bound2)
    return w1, b1, w2, b2


def fuse_params(w1, b1, w2, b2):
    """Fold the two linear layers + bias into one augmented, transposed table.

    Exact up to fp32 rounding (no nonlinearity between the Linears in the
    original module).  Returns wct_aug [OUTPUT_SIZE, INPUT_SIZE + 1] where the
    last column is the fused bias.
    """
    wc = jnp.dot(w1, w2, preferred_element_type=jnp.float32)        # [IN, OUT]
    bc = jnp.dot(b1, w2, preferred_element_type=jnp.float32) + b2   # [1, OUT]
    return jnp.concatenate([wc, bc], axis=0).T                      # [OUT, IN+1]


def _pick_tile(B):
    """Largest 128-multiple divisor of B, capped at 1024 (vreg-spill bound).

    For B that is not a multiple of 128 (or B <= 128), use a single block
    covering the whole batch.
    """
    if B % 128 != 0:
        return B
    for tb in (1024, 896, 768, 640, 512, 384, 256, 128):
        if tb <= B and B % tb == 0:
            return tb
    return B


def policy_net_forward_batch(idx, wct_aug):
    """idx: int32 [B] of state indices.

    Returns probabilities in the lane-dense [OUTPUT_SIZE, B] layout (column b
    is the probability vector for idx[b]).  Downstream consumers (sampling,
    logp) should read this layout directly to avoid a transpose pass.
    """
    B = idx.shape[0]
    TB = _pick_tile(B)
    idx_row = idx.astype(jnp.int32).reshape(1, B)

    out_t = pl.pallas_call(
        policy_kernel,
        out_shape=jax.ShapeDtypeStruct((OUTPUT_SIZE, B), jnp.float32),
        grid_spec=pltpu.PrefetchScalarGridSpec(
            num_scalar_prefetch=0,
            grid=(B // TB,),
            in_specs=[
                pl.BlockSpec((1, TB), lambda b: (0, b)),                      # idx
                pl.BlockSpec((OUTPUT_SIZE, INPUT_SIZE + 1), lambda b: (0, 0)),  # fused table
            ],
            out_specs=pl.BlockSpec((OUTPUT_SIZE, TB), lambda b: (0, b)),
        ),
        compiler_params=pltpu.CompilerParams(
            dimension_semantics=("parallel",)),          # shards only if grid > 1
    )(idx_row, wct_aug)
    return out_t                                                    # [OUT, B]


def policy_net_forward(idx, wct_aug):
    """Single-index API matching PolicyNet.forward(x). Returns [OUTPUT_SIZE].

    Uses a 128-wide replicated-index tile so the writeback stays lane-dense;
    the per-call cost is launch-dominated either way.  For per-timestep RL
    loops, prefer batching pending states into policy_net_forward_batch.
    """
    idx_b = jnp.full((128,), idx, dtype=jnp.int32)
    return policy_net_forward_batch(idx_b, wct_aug)[:, 0]


def reference_forward_batch(idx, w1, b1, w2, b2):
    """Pure-JAX reference of the original (un-fused) module math. [B, OUT]."""
    onehot = jax.nn.one_hot(idx, INPUT_SIZE, dtype=jnp.float32)     # [B, IN]
    h = onehot @ w1 + b1
    logits = h @ w2 + b2
    return jax.nn.softmax(logits, axis=-1)


# TODO(synk): get_action_and_logp / act (Categorical sampling) are not part of
# the forward pass; fusing Gumbel-max sampling (pltpu.prng_seed /
# prng_random_bits) into the kernel epilogue would cut writeback ~8x if the
# probabilities themselves are not needed downstream.

if __name__ == "__main__":
    key = jax.random.PRNGKey(0)
    k_params, k_idx = jax.random.split(key)

    w1, b1, w2, b2 = init_params(k_params)
    wct_aug = fuse_params(w1, b1, w2, b2)

    # Batched example input: 256 integer state indices (single grid step).
    B = 256
    idx = jax.random.randint(k_idx, (B,), 0, INPUT_SIZE, dtype=jnp.int32)

    probs_t = policy_net_forward_batch(idx, wct_aug)                # [OUT, B]
    probs_t = jax.block_until_ready(probs_t)

    ref = reference_forward_batch(idx, w1, b1, w2, b2)              # [B, OUT]
    assert probs_t.shape == (OUTPUT_SIZE, B)
    assert jnp.allclose(jnp.sum(probs_t, axis=0), 1.0, atol=1e-5)
    assert jnp.allclose(probs_t, ref.T, atol=1e-4, rtol=1e-4)

    # Single-index API (the original module's forward(x) for an int state x).
    p5 = jax.block_until_ready(policy_net_forward(jnp.int32(5), wct_aug))
    ref5 = reference_forward_batch(jnp.array([5], jnp.int32), w1, b1, w2, b2)[0]
    assert p5.shape == (OUTPUT_SIZE,)
    assert jnp.allclose(jnp.sum(p5), 1.0, atol=1e-5)
    assert jnp.allclose(p5, ref5, atol=1e-4, rtol=1e-4)

    print("KERNEL_OK")
</pallas_src>

<mosaic_0001>
module attributes {stable_mosaic.version = 11 : i64} {
  func.func @policy_kernel(%arg0: i32, %arg1: memref<1x256xi32, #tpu.memory_space<vmem>>, %arg2: memref<8x17xf32, #tpu.memory_space<vmem>>, %arg3: memref<8x256xf32, #tpu.memory_space<vmem>>) attributes {dimension_semantics = [#tpu.dimension_semantics<parallel>], iteration_bounds = array<i64: 1>, scalar_prefetch = 0 : i64, scratch_operands = 0 : i64, tpu.core_type = #tpu.core_type<tc>, window_params = [{transform_indices = @transform_0, window_bounds = array<i64: 1, 256>}, {pipeline_mode = #tpu.pipeline_mode<synchronous>, transform_indices = @transform_1, window_bounds = array<i64: 8, 17>}, {transform_indices = @transform_2, window_bounds = array<i64: 8, 256>}]} {
    %c0 = arith.constant 0 : index
    %c0_0 = arith.constant 0 : index
    %0 = vector.load %arg1[%c0, %c0_0] : memref<1x256xi32, #tpu.memory_space<vmem>>, vector<1x256xi32>
    %1 = tpu.iota {dimensions = array<i32: 0>} : vector<17x256xi32>
    %2 = vector.broadcast %0 : vector<1x256xi32> to vector<17x256xi32>
    %3 = arith.cmpi eq, %1, %2 : vector<17x256xi32>
    %c16_i32 = arith.constant 16 : i32
    %4 = vector.broadcast %c16_i32 : i32 to vector<17x256xi32>
    %5 = arith.cmpi eq, %1, %4 : vector<17x256xi32>
    %6 = arith.ori %3, %5 : vector<17x256xi1>
    %cst = arith.constant 1.000000e+00 : f32
    %cst_1 = arith.constant 0.000000e+00 : f32
    %7 = vector.broadcast %cst : f32 to vector<17x256xf32>
    %8 = vector.broadcast %cst_1 : f32 to vector<17x256xf32>
    %9 = arith.select %6, %7, %8 : vector<17x256xi1>, vector<17x256xf32>
    %c0_2 = arith.constant 0 : index
    %c0_3 = arith.constant 0 : index
    %10 = vector.load %arg2[%c0_2, %c0_3] : memref<8x17xf32, #tpu.memory_space<vmem>>, vector<8x17xf32>
    %cst_4 = arith.constant dense<0.000000e+00> : vector<8x256xf32>
    %11 = tpu.matmul %10, %9, %cst_4 {dimension_numbers = #tpu.dot_dimension_numbers<[1], [0], [0], [1], [0, 0, 1, 1], [], []>} : vector<8x17xf32>, vector<17x256xf32>, vector<8x256xf32> -> vector<8x256xf32>
    %cst_5 = arith.constant dense<0xFF800000> : vector<256xf32>
    %12 = vector.multi_reduction <maximumf>, %11, %cst_5 [0] : vector<8x256xf32> to vector<256xf32>
    %13 = vector.shape_cast %12 : vector<256xf32> to vector<1x256xf32>
    %14 = vector.broadcast %13 : vector<1x256xf32> to vector<8x256xf32>
    %15 = arith.subf %11, %14 : vector<8x256xf32>
    %16 = math.exp %15 : vector<8x256xf32>
    %cst_6 = arith.constant dense<0.000000e+00> : vector<256xf32>
    %17 = vector.multi_reduction <add>, %16, %cst_6 [0] : vector<8x256xf32> to vector<256xf32>
    %18 = vector.shape_cast %17 : vector<256xf32> to vector<1x256xf32>
    %19 = vector.broadcast %18 : vector<1x256xf32> to vector<8x256xf32>
    %20 = arith.divf %16, %19 : vector<8x256xf32>
    %c0_7 = arith.constant 0 : index
    %c0_8 = arith.constant 0 : index
    %21 = vector.load %arg3[%c0_7, %c0_8] : memref<8x256xf32, #tpu.memory_space<vmem>>, vector<8x256xf32>
    tpu.vector_store %arg3[%c0_7, %c0_8], %20 {strides = array<i32>} : memref<8x256xf32, #tpu.memory_space<vmem>>, vector<8x256xf32>,
    return
  }
  func.func @transform_0(%arg0: i32) -> (i32, i32) {
    %c0_i32 = arith.constant 0 : i32
    %c0_i32_0 = arith.constant 0 : i32
    return %c0_i32, %arg0 : i32, i32
  }
  func.func @transform_1(%arg0: i32) -> (i32, i32) {
    %c0_i32 = arith.constant 0 : i32
    %c0_i32_0 = arith.constant 0 : i32
    %c0_i32_1 = arith.constant 0 : i32
    return %c0_i32, %c0_i32_0 : i32, i32
  }
  func.func @transform_2(%arg0: i32) -> (i32, i32) {
    %c0_i32 = arith.constant 0 : i32
    %c0_i32_0 = arith.constant 0 : i32
    return %c0_i32, %arg0 : i32, i32
  }
}

</mosaic_0001>

<bundles_post_ra>
// kernel: tpu_custom_call.1
= control target key start
LH: loop header
LB: loop body
LE: loop exit
PB: predicated region body
PF: predicated region fallthrough
CT: control target
= control target key end

     0   :  { %7 = vsyncpa [#allocation3], 0  ;;  %s359_s0 = inlined_call_operand.hbm [shape: s32[1,256], index: 0, kind: input, shape index: {}]   ;;  %s360_s1 = inlined_call_operand.hbm [shape: f32[8,17], index: 1, kind: input, shape index: {}]   ;;  %s361_s2 = inlined_call_operand.hbm [shape: f32[8,256], index: 2, kind: output, shape index: {}]  }
   0x1   :  { %8 = vsyncpa [#allocation6], 0 }
   0x2   :  { %9 = vsyncpa [#allocation4], 0  ;;  %s301_s9 = smov [#allocation2]   ;;  %s302_s11 = smov [#allocation5]  }
   0x3   :  { %s16_s10 = sshll.u32 %s301_s9, 4  ;;  %s26_s12 = sshll.u32 %s302_s11, 4  ;;  %s17_s10 = int_to_ptr.vmem [resolvable:$true] %s16_s10  ;;  %s27_s12 = int_to_ptr.vmem [resolvable:$true] %s26_s12 }
   0x4   :  { %s229_s15 = scalar_lea.hbm %s359_s0, 32 }
   0x5   :  { %p230_p0 = scmp.ne.s32.totalorder %s359_s0, %s229_s15  ;;  %p233_p1 = scmp.lt.u32.totalorder %s229_s15, %s359_s0 }
   0x7   :  { %p235_p2 = pnand %p233_p1, %p230_p0 }
   0x9   :  { %238 = shalt.err (!%p235_p2)
}
   0xa   :  { %s239_s20 = scalar_lea.vmem %s17_s10, 32  ;;  %p244_p4 = scmp.lt.s32.totalorder %s17_s10, %s17_s10 }
   0xb   :  { %p240_p3 = scmp.ne.s32.totalorder %s17_s10, %s239_s20  ;;  %p245_p5 = scmp.lt.s32.totalorder %s239_s20, %s239_s20 }
   0xd   :  { %p246_p6 = por %p245_p5, %p244_p4 }
   0xf   :  { %p247_p7 = pnand %p246_p6, %p240_p3 }
  0x11   :  { %250 = shalt.err (!%p247_p7)
}
  0x12   :  { %19 = dma.hbm_to_vmem [thread:$0]  %s359_s0, 32, %s17_s10, [#allocation3]  }
  0x13   :  { %s251_s25 = scalar_lea.hbm %s360_s1, 128 }
  0x14   :  { %p252_p8 = scmp.ne.s32.totalorder %s360_s1, %s251_s25  ;;  %p255_p9 = scmp.lt.u32.totalorder %s251_s25, %s360_s1 }
  0x16   :  { %p257_p10 = pnand %p255_p9, %p252_p8 }
  0x18   :  { %260 = shalt.err (!%p257_p10)
}
  0x19   :  { %s261_s30 = scalar_lea.vmem %s27_s12, 128  ;;  %p266_p12 = scmp.lt.s32.totalorder %s27_s12, %s27_s12 }
  0x1a   :  { %p262_p11 = scmp.ne.s32.totalorder %s27_s12, %s261_s30  ;;  %p267_p13 = scmp.lt.s32.totalorder %s261_s30, %s261_s30 }
  0x1c   :  { %p268_p0 = por %p267_p13, %p266_p12 }
  0x1e   :  { %p269_p1 = pnand %p268_p0, %p262_p11 }
  0x20   :  { %272 = shalt.err (!%p269_p1)
}
  0x21   :  { %29 = dma.hbm_to_vmem [thread:$0]  %s360_s1, 128, %s27_s12, [#allocation6]  }
  0x22   :  { %295 = dma.done.wait [#allocation3], 32  }
  0x23   :  { %296 = vsyncadd [#allocation3], 4294967264 }
  0x24   :  { %297 = dma.done.wait [#allocation6], 128  }
  0x25   :  { %298 = vsyncadd [#allocation6], 4294967168  ;;  %v37_v0 = vlaneseq  ;;  %v303_v1 = vmov 0.0   ;;  %v36_v7 = vld [vmem:[#allocation2] sm:$0x3]  ;;  %vm75_vm9 = vcmask 1040384  }
  0x26   :  { %146 = vmatprep.mubr.f32.mxu0 %v303_v1  ;;  %v304_v10 = vmov 1.0|1.0   ;;  %v70_v13 = vld [vmem:[#allocation5] sm:$0xff]  ;;  %vm71_vm12 = vcmask 138240   ;;  %s305_s1 = smov [#allocation7]  }
  0x27   :  { %v38_v2 = vshrl.u32 %v37_v0, 7  ;;  %s195_s4 = sshll.u32 %s305_s1, 4  ;;  %s196_s4 = int_to_ptr.vmem [resolvable:$true] %s195_s4 }
  0x28   :  { %s273_s5 = scalar_lea.vmem %s196_s4, 256  ;;  %p278_p3 = scmp.lt.s32.totalorder %s196_s4, %s196_s4 }
  0x29   :  { %v47_v3 = vsub.s32 1, %v38_v2  ;;  %v43_v4 = vsub.s32 0, %v38_v2  ;;  %v40_v5 = vadd.s32 16, %v38_v2  ;;  %v39_v6 = vadd.s32 8, %v38_v2  ;;  %p274_p2 = scmp.ne.s32.totalorder %s196_s4, %s273_s5  ;;  %p279_p4 = scmp.lt.s32.totalorder %s273_s5, %s273_s5 }
  0x2b   :  { %v48_v8 = vrot.slane %v36_v7, %v47_v3  ;;  %v44_v9 = vrot.slane %v36_v7, %v43_v4  ;;  %vm57_vm0 = vcmp.eq.s32.totalorder %v40_v5, 16  ;;  %p280_p5 = por %p279_p4, %p278_p3 }
  0x2d   :  { %vm50_vm1 = vcmp.eq.s32.totalorder %v38_v2, %v48_v8  ;;  %vm52_vm2 = vcmp.eq.s32.totalorder %v39_v6, %v48_v8  ;;  %vm49_vm3 = vcmp.eq.s32.totalorder %v38_v2, %v44_v9  ;;  %vm51_vm4 = vcmp.eq.s32.totalorder %v39_v6, %v44_v9  ;;  %p281_p6 = pnand %p280_p5, %p274_p2 }
  0x2e   :  { %vm212_vm5 = vmpackc.low %vm52_vm2, %vm50_vm1  ;;  %vm54_vm6 = vcmp.eq.s32.totalorder %v40_v5, %v48_v8  ;;  %vm53_vm7 = vcmp.eq.s32.totalorder %v40_v5, %v44_v9 }
  0x2f   :  { %213 = vmatprep.subr.msk.bf16.mxu0 %vm212_vm5, %v304_v10  ;;  %vm214_vm8 = vmpackc.low %vm51_vm4, %vm49_vm3 }
  0x30   :  { %215 = vmatpush1.bf16.msk.msra.mxu0 %vm214_vm8, %v304_v10  ;;  %vm63_vm10 = vmor %vm54_vm6, %vm57_vm0 }
  0x31   :  { %v69_v11 = vsel %vm63_vm10, 1.0, %v303_v1  ;;  %vm62_vm11 = vmor %vm53_vm7, %vm57_vm0 }
  0x32   :  { %209 = vmatprep.subr.msk.mxu0 %vm75_vm9, %v69_v11  ;;  %v68_v12 = vsel %vm62_vm11, 1.0, %v303_v1 }
  0x34   :  { %210 = vmatpush1.msk.msra.mxu0 %vm75_vm9, %v68_v12 }
  0x35   :  { %211 = vmatmul.mubr.msk.f32.vlgmr.msra.gmra.mrb[0].mxu0 %vm71_vm12, %v70_v13 }
 0x108   :  { %v148_v14 = vpop.f32.mrb[0].mxu0 }
 0x109   :  { %v153_v15 = vrot.slane %v148_v14, 4  ;;  %v150_v16 = vpop.f32.mrb[1].mxu0 }
 0x10a   :  { %v159_v17 = vrot.slane %v150_v16, 4 }
 0x10b   :  { %v154_v18 = vmax.f32 %v148_v14, %v153_v15 }
 0x10c   :  { %v160_v19 = vmax.f32 %v150_v16, %v159_v17 }
 0x10d   :  { %v155_v20 = vrot.slane %v154_v18, 2 }
 0x10e   :  { %v161_v21 = vrot.slane %v160_v19, 2 }
 0x10f   :  { %v156_v22 = vmax.f32 %v154_v18, %v155_v20 }
 0x110   :  { %v162_v23 = vmax.f32 %v160_v19, %v161_v21 }
 0x111   :  { %v157_v24 = vrot.slane %v156_v22, 1 }
 0x112   :  { %v163_v25 = vrot.slane %v162_v23, 1 }
 0x113   :  { %v158_v26 = vmax.f32 %v156_v22, %v157_v24 }
 0x114   :  { %v164_v27 = vmax.f32 %v162_v23, %v163_v25 }
 0x115   :  { %v165_v28 = vsub.f32 %v148_v14, %v158_v26 }
 0x116   :  { %v166_v29 = vsub.f32 %v150_v16, %v164_v27 }
 0x117   :  { %v167_v30 = vmul.f32 1.442695, %v165_v28 }
 0x118   :  { %v169_v31 = vmul.f32 1.442695, %v166_v29 }
 0x119   :  { %221 = vpow2.f32 %v167_v30 }
 0x11a   :  { %223 = vpow2.f32 %v169_v31 }
 0x123   :  { %v222_v32 = vpop.eup %221 }
 0x124   :  { %v224_v33 = vpop.eup %223  ;;  %v171_v34 = vrot.slane %v222_v32, 4 }
 0x125   :  { %v177_v35 = vrot.slane %v224_v33, 4 }
 0x126   :  { %v172_v36 = vadd.f32 %v222_v32, %v171_v34 }
 0x127   :  { %v178_v37 = vadd.f32 %v224_v33, %v177_v35 }
 0x128   :  { %v173_v38 = vrot.slane %v172_v36, 2 }
 0x129   :  { %v179_v39 = vrot.slane %v178_v37, 2 }
 0x12a   :  { %v174_v40 = vadd.f32 %v173_v38, %v172_v36 }
 0x12b   :  { %v180_v41 = vadd.f32 %v179_v39, %v178_v37 }
 0x12c   :  { %v175_v42 = vrot.slane %v174_v40, 1 }
 0x12d   :  { %v181_v43 = vrot.slane %v180_v41, 1 }
 0x12e   :  { %v176_v44 = vadd.f32 %v175_v42, %v174_v40 }
 0x12f   :  { %v182_v45 = vadd.f32 %v181_v43, %v180_v41 }
 0x130   :  { %225 = vrcp.f32 %v176_v44 }
 0x131   :  { %227 = vrcp.f32 %v182_v45 }
 0x13a   :  { %v226_v46 = vpop.eup %225 }
 0x13b   :  { %v228_v47 = vpop.eup %227  ;;  %v184_v48 = vmul.f32 %v226_v46, %v222_v32 }
 0x13c   :  { %v186_v49 = vmul.f32 %v228_v47, %v224_v33 }
 0x13d   :  { %187 = vst [vmem:[#allocation7] sm:$0xff] %v184_v48 }
 0x13e   :  { %188 = vst [vmem:[#allocation7 + $0x8] sm:$0xff] %v186_v49 }
 0x13f   :  { %284 = shalt.err (!%p281_p6)
}
 0x140   :  { %s285_s8 = scalar_lea.hbm %s361_s2, 256 }
 0x141   :  { %p286_p7 = scmp.ne.s32.totalorder %s361_s2, %s285_s8  ;;  %p289_p8 = scmp.lt.u32.totalorder %s285_s8, %s361_s2 }
 0x143   :  { %p291_p9 = pnand %p289_p8, %p286_p7 }
 0x145   :  { %294 = shalt.err (!%p291_p9)
}
 0x146   :  { %198 = dma.vmem_to_hbm [thread:$0]  %s196_s4, 256, %s361_s2, [#allocation4]  }
 0x147   :  { %299 = dma.done.wait [#allocation4], 256  }
 0x148   :  { %300 = vsyncadd [#allocation4], 4294967040 }
 0x149   :  { %202 = vsyncpa [#allocation3], 1 }
 0x14a   :  { %203 = vsyncpa [#allocation6], 1 }
 0x14b   :  { %204 = vsyncpa [#allocation4], 1 }

</bundles_post_ra>
